<compile_context>
chip_gen: v5e
topology: v5e:2x2
jax: 0.10.0
libtpu: 0.0.40
codegen_flags: <defaults>
</compile_context>

<pallas_src>
import functools

import jax
import jax.numpy as jnp
from jax.experimental import pallas as pl
from jax.experimental.pallas import tpu as pltpu

HIDDEN_DIM = 16
_LANES = 128
_SUBLANES = 8


def _round_up(n, m):
    return ((n + m - 1) // m) * m


def _linear_relu_kernel(x_ref, w_ref, b_ref, o_ref):
    # (tm/pack, pack*F) @ (pack*F, pack*H) on the MXU, bias add + ReLU on the
    # VPU, straight lane-dense store (no reshape / relayout in the kernel).
    acc = jnp.dot(x_ref[...], w_ref[...], preferred_element_type=jnp.float32)
    o_ref[...] = jnp.maximum(acc + b_ref[...], 0.0).astype(o_ref.dtype)


@functools.partial(jax.jit, static_argnames=("block_rows",))
def first_net_forward(x, w, b, *, block_rows=4096):
    """relu(x @ w + b).  x: (B, F) f32, w: (F, H) f32, b: (H,) f32 -> (B, H) f32."""
    B, F = x.shape
    H = w.shape[1]

    # Lane packing: fold `pack` logical rows into one 128-lane row so both the
    # input load and the output store are lane-dense.  Guard: only if H | 128.
    pack = _LANES // H if (_LANES % H == 0) else 1
    row_align = _SUBLANES * pack                       # 64 rows for H=16

    # Block-diagonal weight / tiled bias (tiny, built once per call):
    #   reshape(x, (B/pack, pack*F)) @ kron(I_pack, w)  ==  packed (x @ w)
    w_eff = jnp.kron(jnp.eye(pack, dtype=w.dtype), w)          # (pack*F, pack*H)
    b_eff = jnp.tile(b, pack).reshape(1, pack * H)              # (1, pack*H)

    # Pad only up to the row alignment (<= 63 rows, tiny copy), NOT to a
    # multiple of the batch tile; ragged last grid tiles are masked by Pallas.
    b_pad = _round_up(B, row_align)
    if b_pad != B:
        x = jnp.pad(x, ((0, b_pad - B), (0, 0)))
    rows_p = b_pad // pack                                      # packed rows (mult of 8)
    x_p = x.reshape(rows_p, pack * F)                           # free row-major view

    # Batch tile: as large as block_rows, but clamped so big batches keep >= 2
    # grid steps (feeds both v7x TensorCores) and never exceed the padded batch.
    # All candidates are multiples of row_align, so tm is too.
    tm = min(
        max(_round_up(block_rows, row_align), row_align),
        _round_up(pl.cdiv(B, 2), row_align),
        b_pad,
    )
    tm = max(tm, row_align)
    tmp = tm // pack                                            # packed rows per step
    grid = (pl.cdiv(rows_p, tmp),)

    out = pl.pallas_call(
        _linear_relu_kernel,
        out_shape=jax.ShapeDtypeStruct((rows_p, pack * H), jnp.float32),
        grid=grid,
        in_specs=[
            pl.BlockSpec((tmp, pack * F), lambda i: (i, 0)),        # x, pipelined
            pl.BlockSpec((pack * F, pack * H), lambda i: (0, 0)),   # block-diag W, resident
            pl.BlockSpec((1, pack * H), lambda i: (0, 0)),          # tiled bias, resident
        ],
        out_specs=pl.BlockSpec((tmp, pack * H), lambda i: (i, 0)),
        compiler_params=pltpu.CompilerParams(
            dimension_semantics=("parallel",),                      # no cross-step carries
        ),
        cost_estimate=pl.CostEstimate(
            flops=2 * B * F * H,
            transcendentals=0,
            bytes_accessed=4 * (B * F + B * H + F * H + H),
        ),
    )(x_p, w_eff, b_eff)

    # Free, contiguous un-pack back to (B, H); padded rows are sliced away.
    return out.reshape(b_pad, H)[:B]


if __name__ == "__main__":
    key = jax.random.PRNGKey(0)
    k_x, k_w, k_b = jax.random.split(key, 3)

    batch = 8
    in_features = 32  # train_features.shape[-1]

    # Deterministic parameter init mimicking nn.Linear's U(-1/sqrt(F), 1/sqrt(F)).
    bound = 1.0 / jnp.sqrt(jnp.float32(in_features))
    x = jax.random.normal(k_x, (batch, in_features), dtype=jnp.float32)
    w = jax.random.uniform(k_w, (in_features, HIDDEN_DIM), jnp.float32,
                           minval=-bound, maxval=bound)
    b = jax.random.uniform(k_b, (HIDDEN_DIM,), jnp.float32,
                           minval=-bound, maxval=bound)

    out = jax.block_until_ready(first_net_forward(x, w, b))
    ref = jnp.maximum(x @ w + b, 0.0)
    assert out.shape == (batch, HIDDEN_DIM)
    assert jnp.allclose(out, ref, atol=1e-5, rtol=1e-5)

    # Exercise the multi-tile + alignment-pad + ragged-last-tile path.
    big_batch = 777
    xb = jax.random.normal(k_x, (big_batch, in_features), dtype=jnp.float32)
    out_b = jax.block_until_ready(first_net_forward(xb, w, b))
    ref_b = jnp.maximum(xb @ w + b, 0.0)
    assert out_b.shape == (big_batch, HIDDEN_DIM)
    assert jnp.allclose(out_b, ref_b, atol=1e-5, rtol=1e-5)

    print("KERNEL_OK")
</pallas_src>

<mosaic_0001>
module attributes {stable_mosaic.version = 11 : i64} {
  func.func @_linear_relu_kernel(%arg0: i32, %arg1: memref<8x256xf32, #tpu.memory_space<vmem>>, %arg2: memref<256x128xf32, #tpu.memory_space<vmem>>, %arg3: memref<1x128xf32, #tpu.memory_space<vmem>>, %arg4: memref<8x128xf32, #tpu.memory_space<vmem>>) attributes {dimension_semantics = [#tpu.dimension_semantics<parallel>], iteration_bounds = array<i64: 1>, scalar_prefetch = 0 : i64, scratch_operands = 0 : i64, tpu.core_type = #tpu.core_type<tc>, window_params = [{transform_indices = @transform_0, window_bounds = array<i64: 8, 256>}, {pipeline_mode = #tpu.pipeline_mode<synchronous>, transform_indices = @transform_1, window_bounds = array<i64: 256, 128>}, {pipeline_mode = #tpu.pipeline_mode<synchronous>, transform_indices = @transform_2, window_bounds = array<i64: 1, 128>}, {transform_indices = @transform_3, window_bounds = array<i64: 8, 128>}]} {
    %c0 = arith.constant 0 : index
    %c0_0 = arith.constant 0 : index
    %0 = vector.load %arg1[%c0, %c0_0] : memref<8x256xf32, #tpu.memory_space<vmem>>, vector<8x256xf32>
    %c0_1 = arith.constant 0 : index
    %c0_2 = arith.constant 0 : index
    %1 = vector.load %arg2[%c0_1, %c0_2] : memref<256x128xf32, #tpu.memory_space<vmem>>, vector<256x128xf32>
    %cst = arith.constant dense<0.000000e+00> : vector<8x128xf32>
    %2 = tpu.matmul %0, %1, %cst {dimension_numbers = #tpu.dot_dimension_numbers<[1], [0], [0], [1], [0, 0, 1, 1], [], []>} : vector<8x256xf32>, vector<256x128xf32>, vector<8x128xf32> -> vector<8x128xf32>
    %c0_3 = arith.constant 0 : index
    %c0_4 = arith.constant 0 : index
    %3 = vector.load %arg3[%c0_3, %c0_4] : memref<1x128xf32, #tpu.memory_space<vmem>>, vector<1x128xf32>
    %4 = vector.broadcast %3 : vector<1x128xf32> to vector<8x128xf32>
    %5 = arith.addf %2, %4 : vector<8x128xf32>
    %cst_5 = arith.constant 0.000000e+00 : f32
    %6 = vector.broadcast %cst_5 : f32 to vector<8x128xf32>
    %7 = arith.maximumf %5, %6 : vector<8x128xf32>
    %c0_6 = arith.constant 0 : index
    %c0_7 = arith.constant 0 : index
    %8 = vector.load %arg4[%c0_6, %c0_7] : memref<8x128xf32, #tpu.memory_space<vmem>>, vector<8x128xf32>
    tpu.vector_store %arg4[%c0_6, %c0_7], %7 {strides = array<i32>} : memref<8x128xf32, #tpu.memory_space<vmem>>, vector<8x128xf32>,
    return
  }
  func.func @transform_0(%arg0: i32) -> (i32, i32) {
    %c0_i32 = arith.constant 0 : i32
    %c0_i32_0 = arith.constant 0 : i32
    return %arg0, %c0_i32 : i32, i32
  }
  func.func @transform_1(%arg0: i32) -> (i32, i32) {
    %c0_i32 = arith.constant 0 : i32
    %c0_i32_0 = arith.constant 0 : i32
    %c0_i32_1 = arith.constant 0 : i32
    return %c0_i32, %c0_i32_0 : i32, i32
  }
  func.func @transform_2(%arg0: i32) -> (i32, i32) {
    %c0_i32 = arith.constant 0 : i32
    %c0_i32_0 = arith.constant 0 : i32
    %c0_i32_1 = arith.constant 0 : i32
    return %c0_i32, %c0_i32_0 : i32, i32
  }
  func.func @transform_3(%arg0: i32) -> (i32, i32) {
    %c0_i32 = arith.constant 0 : i32
    %c0_i32_0 = arith.constant 0 : i32
    return %arg0, %c0_i32 : i32, i32
  }
}

</mosaic_0001>

<bundles_post_ra>
// kernel: tile.8
= control target key start
LH: loop header
LB: loop body
LE: loop exit
PB: predicated region body
PF: predicated region fallthrough
CT: control target
= control target key end

     0   :  { %s22_s0 = inlined_call_operand.vmem [shape: f32[16], index: 0, kind: input, shape index: {}]   ;;  %s23_s1 = inlined_call_operand.vmem [shape: f32[8,16], index: 1, kind: output, shape index: {}]  }
   0x1   :  { %v4_v0 = vld [vmem:[%s22_s0] ss:$0 sm:$0xff] }
   0x2   :  { %5 = vst [vmem:[%s23_s1] sm:$0xff] %v4_v0 }

// kernel: tile.9
= control target key start
LH: loop header
LB: loop body
LE: loop exit
PB: predicated region body
PF: predicated region fallthrough
CT: control target
= control target key end

     0   :  { %s67_s10 = smov 112   ;;  %s68_s11 = smov 80   ;;  %vm3_vm0 = vcmask 130048   ;;  %vm9_vm1 = vcmask 1048448   ;;  %vm15_vm2 = vcmask 917248   ;;  %vm21_vm3 = vcmask 786048   ;;  %s111_s0 = inlined_call_operand.vmem [shape: f32[8,16], index: 0, kind: input, shape index: {}]   ;;  %s112_s1 = inlined_call_operand.vmem [shape: f32[1,128], index: 1, kind: output, shape index: {}]  }
   0x1   :  { %v53_v0 = vld [vmem:[%s111_s0 + $0x7] sm:$0x1]   ;;  %v55_v1 = vld [vmem:[%s111_s0 + $0x5] sm:$0x1]   ;;  %v57_v2 = vld [vmem:[%s111_s0 + $0x3] sm:$0x1]  }
   0x2   :  { %7 = vrot.lane.b32.xlu0 %v53_v0, %s67_s10  ;;  %19 = vrot.lane.b32.xlu1 %v55_v1, %s68_s11  ;;  %s69_s14 = smov 48   ;;  %v54_v3 = vld [vmem:[%s111_s0 + $0x6] sm:$0x1]   ;;  %v56_v4 = vld [vmem:[%s111_s0 + $0x4] sm:$0x1]   ;;  %s70_s21 = smov 96  }
   0x3   :  { %31 = vrot.lane.b32.xlu2 %v57_v2, %s69_s14  ;;  %v58_v5 = vld [vmem:[%s111_s0 + $0x2] sm:$0x1]   ;;  %s71_s22 = smov 64   ;;  %s72_s23 = smov 32   ;;  %v59_v6 = vld [vmem:[%s111_s0 + $0x1] sm:$0x1]  }
   0x4   :  { %s73_s26 = smov 16   ;;  %v2_v7 = vld [vmem:[%s111_s0] sm:$0x1]   ;;  %vm27_vm4 = vcmask 654848   ;;  %vm33_vm5 = vcmask 523648   ;;  %vm39_vm6 = vcmask 392448  }
   0x5   :  { %4 = vst.msk [vmem:[#allocation0] sm:$0x1] %vm3_vm0, %v2_v7   ;;  %vm45_vm7 = vcmask 261248  }
   0xa   :  { %13 = vrot.lane.b32.xlu0 %v54_v3, %s70_s21  ;;  %25 = vrot.lane.b32.xlu1 %v56_v4, %s71_s22 }
   0xb   :  { %37 = vrot.lane.b32.xlu2 %v58_v5, %s72_s23 }
  0x12   :  { %43 = vrot.lane.b32.xlu0 %v59_v6, %s73_s26 }
  0x5d   :  { %v32_v8 = vpop.permute.xlu2 %31  }
  0x65   :  { %v38_v9 = vpop.permute.xlu2 %37  }
  0x74   :  { %v8_v10 = vpop.permute.xlu0 %7   ;;  %v20_v11 = vpop.permute.xlu1 %19  }
  0x75   :  { %10 = vst.msk [vmem:[#allocation0] sm:$0x1] %vm9_vm1, %v8_v10  }
  0x7c   :  { %v14_v12 = vpop.permute.xlu0 %13   ;;  %v26_v13 = vpop.permute.xlu1 %25  }
  0x7d   :  { %16 = vst.msk [vmem:[#allocation0] sm:$0x1] %vm15_vm2, %v14_v12  }
  0x7e   :  { %22 = vst.msk [vmem:[#allocation0] sm:$0x1] %vm21_vm3, %v20_v11  }
  0x7f   :  { %28 = vst.msk [vmem:[#allocation0] sm:$0x1] %vm27_vm4, %v26_v13  }
  0x80   :  { %34 = vst.msk [vmem:[#allocation0] sm:$0x1] %vm33_vm5, %v32_v8  }
  0x81   :  { %40 = vst.msk [vmem:[#allocation0] sm:$0x1] %vm39_vm6, %v38_v9  }
  0x84   :  { %v44_v14 = vpop.permute.xlu0 %43  }
  0x85   :  { %46 = vst.msk [vmem:[#allocation0] sm:$0x1] %vm45_vm7, %v44_v14  }
  0x8c   :  { %v49_v15 = vld [vmem:[#allocation0] sm:$0x1] }
  0x8d   :  { %52 = vst [vmem:[%s112_s1] sm:$0x1] %v49_v15 }

// kernel: first_net_forward.1
= control target key start
LH: loop header
LB: loop body
LE: loop exit
PB: predicated region body
PF: predicated region fallthrough
CT: control target
= control target key end

     0   :  { %s227_s1 = inlined_call_operand.vmem [shape: f32[256,128], index: 1, kind: input, shape index: {}]   ;;  %s228_s2 = inlined_call_operand.vmem [shape: f32[1,128], index: 2, kind: input, shape index: {}]   ;;  %s229_s0 = inlined_call_operand.vmem [shape: f32[8,256], index: 0, kind: input, shape index: {}]   ;;  %s230_s3 = inlined_call_operand.vmem [shape: f32[8,128], index: 3, kind: output, shape index: {}]  }
   0x1   :  { %v31_v0 = vld [vmem:[%s227_s1 + $0x78] sm:$0xff]  ;;  %v30_v1 = vld [vmem:[%s227_s1 + $0x70] sm:$0xff]  ;;  %v29_v4 = vld [vmem:[%s227_s1 + $0x68] sm:$0xff] }
   0x2   :  { %v47_v2 = vld [vmem:[%s227_s1 + $0xf8] sm:$0xff]  ;;  %52 = vmatpush.msra.mxu0 %v31_v0  ;;  %v46_v3 = vld [vmem:[%s227_s1 + $0xf0] sm:$0xff]  ;;  %v45_v5 = vld [vmem:[%s227_s1 + $0xe8] sm:$0xff] }
   0x3   :  { %72 = vmatpush.msra.mxu1 %v47_v2  ;;  %v28_v6 = vld [vmem:[%s227_s1 + $0x60] sm:$0xff]  ;;  %v27_v8 = vld [vmem:[%s227_s1 + $0x58] sm:$0xff]  ;;  %v26_v10 = vld [vmem:[%s227_s1 + $0x50] sm:$0xff] }
   0x4   :  { %53 = vmatpush.msra.mxu0 %v30_v1  ;;  %v44_v7 = vld [vmem:[%s227_s1 + $0xe0] sm:$0xff]  ;;  %v43_v9 = vld [vmem:[%s227_s1 + $0xd8] sm:$0xff]  ;;  %v42_v11 = vld [vmem:[%s227_s1 + $0xd0] sm:$0xff] }
   0x5   :  { %73 = vmatpush.msra.mxu1 %v46_v3  ;;  %v25_v12 = vld [vmem:[%s227_s1 + $0x48] sm:$0xff]  ;;  %v24_v14 = vld [vmem:[%s227_s1 + $0x40] sm:$0xff]  ;;  %v23_v16 = vld [vmem:[%s227_s1 + $0x38] sm:$0xff] }
   0x6   :  { %54 = vmatpush.msra.mxu0 %v29_v4  ;;  %v41_v13 = vld [vmem:[%s227_s1 + $0xc8] sm:$0xff]  ;;  %v40_v15 = vld [vmem:[%s227_s1 + $0xc0] sm:$0xff]  ;;  %v39_v17 = vld [vmem:[%s227_s1 + $0xb8] sm:$0xff] }
   0x7   :  { %74 = vmatpush.msra.mxu1 %v45_v5  ;;  %v22_v18 = vld [vmem:[%s227_s1 + $0x30] sm:$0xff]  ;;  %v21_v20 = vld [vmem:[%s227_s1 + $0x28] sm:$0xff]  ;;  %v20_v22 = vld [vmem:[%s227_s1 + $0x20] sm:$0xff] }
   0x8   :  { %55 = vmatpush.msra.mxu0 %v28_v6  ;;  %v38_v19 = vld [vmem:[%s227_s1 + $0xb0] sm:$0xff]  ;;  %v37_v21 = vld [vmem:[%s227_s1 + $0xa8] sm:$0xff]  ;;  %v36_v23 = vld [vmem:[%s227_s1 + $0xa0] sm:$0xff] }
   0x9   :  { %75 = vmatpush.msra.mxu1 %v44_v7  ;;  %v19_v24 = vld [vmem:[%s227_s1 + $0x18] sm:$0xff]  ;;  %v18_v26 = vld [vmem:[%s227_s1 + $0x10] sm:$0xff]  ;;  %v17_v28 = vld [vmem:[%s227_s1 + $0x8] sm:$0xff] }
   0xa   :  { %56 = vmatpush.msra.mxu0 %v27_v8  ;;  %v35_v25 = vld [vmem:[%s227_s1 + $0x98] sm:$0xff]  ;;  %v34_v27 = vld [vmem:[%s227_s1 + $0x90] sm:$0xff]  ;;  %v33_v29 = vld [vmem:[%s227_s1 + $0x88] sm:$0xff] }
   0xb   :  { %76 = vmatpush.msra.mxu1 %v43_v9  ;;  %v16_v30 = vld [vmem:[%s227_s1] sm:$0xff]  ;;  %v15_v33 = vld [vmem:[%s229_s0 + $0x8] sm:$0xff] }
   0xc   :  { %57 = vmatpush.msra.mxu0 %v26_v10  ;;  %v32_v31 = vld [vmem:[%s227_s1 + $0x80] sm:$0xff] }
   0xd   :  { %77 = vmatpush.msra.mxu1 %v42_v11  ;;  %v14_v32 = vld [vmem:[%s229_s0] sm:$0xff] }
   0xe   :  { %58 = vmatpush.msra.mxu0 %v25_v12  ;;  %v98_v34 = vld [vmem:[%s228_s2] ss:$0 sm:$0xff] }
   0xf   :  { %78 = vmatpush.msra.mxu1 %v41_v13 }
  0x10   :  { %59 = vmatpush.msra.mxu0 %v24_v14 }
  0x11   :  { %79 = vmatpush.msra.mxu1 %v40_v15 }
  0x12   :  { %60 = vmatpush.msra.mxu0 %v23_v16 }
  0x13   :  { %80 = vmatpush.msra.mxu1 %v39_v17 }
  0x14   :  { %61 = vmatpush.msra.mxu0 %v22_v18 }
  0x15   :  { %81 = vmatpush.msra.mxu1 %v38_v19 }
  0x16   :  { %62 = vmatpush.msra.mxu0 %v21_v20 }
  0x17   :  { %82 = vmatpush.msra.mxu1 %v37_v21 }
  0x18   :  { %63 = vmatpush.msra.mxu0 %v20_v22 }
  0x19   :  { %83 = vmatpush.msra.mxu1 %v36_v23 }
  0x1a   :  { %64 = vmatpush.msra.mxu0 %v19_v24 }
  0x1b   :  { %84 = vmatpush.msra.mxu1 %v35_v25 }
  0x1c   :  { %65 = vmatpush.msra.mxu0 %v18_v26 }
  0x1d   :  { %85 = vmatpush.msra.mxu1 %v34_v27 }
  0x1e   :  { %66 = vmatpush.msra.mxu0 %v17_v28 }
  0x1f   :  { %86 = vmatpush.msra.mxu1 %v33_v29 }
  0x20   :  { %67 = vmatpush.msra.mxu0 %v16_v30 }
  0x21   :  { %87 = vmatpush.msra.mxu1 %v32_v31  ;;  %68 = vmatmul.f32.vlgmr.msra.gmra.mxu0 %v14_v32 }
  0x22   :  { %88 = vmatmul.f32.vlgmr.msra.gmra.mxu1 %v15_v33 }
  0x9e   :  { %v69_v35 = vpop.f32.mrf.mxu0 }
  0x9f   :  { %v89_v36 = vpop.f32.mrf.mxu1  ;;  %v70_v37 = vadd.f32 %v98_v34, %v69_v35 }
  0xa1   :  { %v90_v38 = vadd.f32 %v89_v36, %v70_v37 }
  0xa3   :  { %v92_v39 = vmax.f32 %v90_v38, 0.0 }
  0xa5   :  { %93 = vst [vmem:[%s230_s3] sm:$0xff] %v92_v39 }

</bundles_post_ra>
